<compile_context>
chip_gen: v7x
topology: tpu7x:2x2x1
jax: 0.10.0
libtpu: 0.0.40
codegen_flags: <defaults>
</compile_context>

<pallas_src>
import jax
import jax.numpy as jnp
from jax.experimental import pallas as pl
from jax.experimental.pallas import tpu as pltpu

_LANE = 128          # TPU lane width; all feature dims padded to this
_H1, _H2, _H3 = 64, 16, 1   # PyTorch layer widths


def _round_up(n, m):
    return (n + m - 1) // m * m


def _disc_kernel(x_ref, w1_ref, b1_ref, w2_ref, b2_ref, w3_ref, b3_ref, o_ref):
    # x: (TB, Dp) bf16. Weights: pre-transposed, zero-padded, bf16.
    # Biases: (1, 128) f32. All activations accumulate in f32 on the MXU.
    h = jnp.dot(x_ref[...], w1_ref[...],
                preferred_element_type=jnp.float32) + b1_ref[...]
    h = jnp.where(h > 0, h, 0.2 * h)                       # LeakyReLU(0.2)

    h = jnp.dot(h.astype(jnp.bfloat16), w2_ref[...],
                preferred_element_type=jnp.float32) + b2_ref[...]
    h = jnp.where(h > 0, h, 0.2 * h)                       # LeakyReLU(0.2)

    h = jnp.dot(h.astype(jnp.bfloat16), w3_ref[...],
                preferred_element_type=jnp.float32) + b3_ref[...]

    # Sigmoid on the full lane-dense slab (padded lanes give 0.5 and are
    # sliced away in the wrapper); exp goes to the EUP.
    o_ref[...] = (1.0 / (1.0 + jnp.exp(-h))).astype(o_ref.dtype)


def init_discriminator_params(key, num_inputs):
    """PyTorch-default nn.Linear init: U(-1/sqrt(fan_in), 1/sqrt(fan_in))."""
    def linear(k, fan_in, fan_out):
        kw, kb = jax.random.split(k)
        bound = 1.0 / float(fan_in) ** 0.5
        w = jax.random.uniform(kw, (fan_out, fan_in), jnp.float32, -bound, bound)
        b = jax.random.uniform(kb, (fan_out,), jnp.float32, -bound, bound)
        return w, b

    k1, k2, k3 = jax.random.split(key, 3)
    w1, b1 = linear(k1, num_inputs, _H1)
    w2, b2 = linear(k2, _H1, _H2)
    w3, b3 = linear(k3, _H2, _H3)
    return {"w1": w1, "b1": b1, "w2": w2, "b2": b2, "w3": w3, "b3": b3}


def pack_params(params, num_inputs):
    """One-time packing: transpose (out,in)->(in,out), zero-pad feature dims to
    128 lanes, cast weights to bf16 (biases stay f32 for the f32 accumulator)."""
    din_pad = _round_up(max(num_inputs, 1), _LANE)

    def pack_w(w, din, din_p):
        wt = jnp.zeros((din_p, _LANE), jnp.float32).at[:din, : w.shape[0]].set(w.T)
        return wt.astype(jnp.bfloat16)

    def pack_b(b):
        return jnp.zeros((1, _LANE), jnp.float32).at[0, : b.shape[0]].set(b)

    return {
        "w1": pack_w(params["w1"], num_inputs, din_pad),
        "b1": pack_b(params["b1"]),
        "w2": pack_w(params["w2"], _H1, _LANE),
        "b2": pack_b(params["b2"]),
        "w3": pack_w(params["w3"], _H2, _LANE),
        "b3": pack_b(params["b3"]),
    }


@jax.jit
def discriminator_forward(x, packed):
    """x: (B, num_inputs) f32. packed: output of pack_params. Returns (B, 1) f32."""
    B, D = x.shape
    Dp = packed["w1"].shape[0]

    # Batch tile: multiple of 8 sublanes, capped so x/out tiles stay small in VMEM.
    TB = min(256, _round_up(B, 8))
    Bp = _round_up(B, TB)

    # Lane-dense, bf16 input slab (zero-padded rows/cols contribute nothing).
    x_p = jnp.zeros((Bp, Dp), jnp.bfloat16).at[:B, :D].set(x.astype(jnp.bfloat16))

    const = lambda i: (0, 0)   # weights/biases resident across all grid steps

    flops = 2 * Bp * (Dp * _LANE + _LANE * _LANE + _LANE * _LANE)
    bytes_accessed = (
        Bp * Dp * 2                                   # x (bf16)
        + (Dp * _LANE + 2 * _LANE * _LANE) * 2        # weights (bf16)
        + 3 * _LANE * 4                               # biases (f32)
        + Bp * _LANE * 4                              # output (f32)
    )

    out = pl.pallas_call(
        _disc_kernel,
        out_shape=jax.ShapeDtypeStruct((Bp, _LANE), jnp.float32),
        grid=(Bp // TB,),
        in_specs=[
            pl.BlockSpec((TB, Dp), lambda i: (i, 0)),      # x tile (pipelined)
            pl.BlockSpec((Dp, _LANE), const),              # w1t
            pl.BlockSpec((1, _LANE), const),               # b1
            pl.BlockSpec((_LANE, _LANE), const),           # w2t
            pl.BlockSpec((1, _LANE), const),               # b2
            pl.BlockSpec((_LANE, _LANE), const),           # w3t
            pl.BlockSpec((1, _LANE), const),               # b3
        ],
        out_specs=pl.BlockSpec((TB, _LANE), lambda i: (i, 0)),
        compiler_params=pltpu.CompilerParams(
            dimension_semantics=("parallel",)),
        cost_estimate=pl.CostEstimate(
            flops=flops, transcendentals=Bp * _LANE, bytes_accessed=bytes_accessed),
    )(x_p, packed["w1"], packed["b1"], packed["w2"], packed["b2"],
      packed["w3"], packed["b3"])

    # Drop batch padding and padded output lanes -> (B, 1), matching PyTorch.
    return out[:B, :_H3]


def _reference_forward(x, params):
    """Pure-JAX f32 reference of the PyTorch forward."""
    h = x @ params["w1"].T + params["b1"]
    h = jnp.where(h > 0, h, 0.2 * h)
    h = h @ params["w2"].T + params["b2"]
    h = jnp.where(h > 0, h, 0.2 * h)
    h = h @ params["w3"].T + params["b3"]
    return jax.nn.sigmoid(h)


if __name__ == "__main__":
    key = jax.random.PRNGKey(0)
    k_param, k_x = jax.random.split(key)

    B, NUM_INPUTS = 8, 32   # small test shapes
    params = init_discriminator_params(k_param, NUM_INPUTS)
    packed = pack_params(params, NUM_INPUTS)
    x = jax.random.normal(k_x, (B, NUM_INPUTS), dtype=jnp.float32)

    out = discriminator_forward(x, packed)
    out = jax.block_until_ready(out)

    ref = _reference_forward(x, params)
    assert out.shape == (B, 1), out.shape
    # bf16 inputs/weights with f32 accumulation; sigmoid output in [0,1].
    assert jnp.allclose(out, ref, atol=2e-2, rtol=2e-2), "mismatch vs reference"

    print("KERNEL_OK")
</pallas_src>

<mosaic_0001>
module attributes {stable_mosaic.version = 11 : i64} {
  func.func @_disc_kernel(%arg0: i32, %arg1: memref<8x128xbf16, #tpu.memory_space<vmem>>, %arg2: memref<128x128xbf16, #tpu.memory_space<vmem>>, %arg3: memref<1x128xf32, #tpu.memory_space<vmem>>, %arg4: memref<128x128xbf16, #tpu.memory_space<vmem>>, %arg5: memref<1x128xf32, #tpu.memory_space<vmem>>, %arg6: memref<128x128xbf16, #tpu.memory_space<vmem>>, %arg7: memref<1x128xf32, #tpu.memory_space<vmem>>, %arg8: memref<8x128xf32, #tpu.memory_space<vmem>>) attributes {dimension_semantics = [#tpu.dimension_semantics<parallel>], iteration_bounds = array<i64: 1>, scalar_prefetch = 0 : i64, scratch_operands = 0 : i64, tpu.core_type = #tpu.core_type<tc>, window_params = [{transform_indices = @transform_0, window_bounds = array<i64: 8, 128>}, {pipeline_mode = #tpu.pipeline_mode<synchronous>, transform_indices = @transform_1, window_bounds = array<i64: 128, 128>}, {pipeline_mode = #tpu.pipeline_mode<synchronous>, transform_indices = @transform_2, window_bounds = array<i64: 1, 128>}, {pipeline_mode = #tpu.pipeline_mode<synchronous>, transform_indices = @transform_3, window_bounds = array<i64: 128, 128>}, {pipeline_mode = #tpu.pipeline_mode<synchronous>, transform_indices = @transform_4, window_bounds = array<i64: 1, 128>}, {pipeline_mode = #tpu.pipeline_mode<synchronous>, transform_indices = @transform_5, window_bounds = array<i64: 128, 128>}, {pipeline_mode = #tpu.pipeline_mode<synchronous>, transform_indices = @transform_6, window_bounds = array<i64: 1, 128>}, {transform_indices = @transform_7, window_bounds = array<i64: 8, 128>}]} {
    %c0 = arith.constant 0 : index
    %c0_0 = arith.constant 0 : index
    %0 = vector.load %arg1[%c0, %c0_0] : memref<8x128xbf16, #tpu.memory_space<vmem>>, vector<8x128xbf16>
    %c0_1 = arith.constant 0 : index
    %c0_2 = arith.constant 0 : index
    %1 = vector.load %arg2[%c0_1, %c0_2] : memref<128x128xbf16, #tpu.memory_space<vmem>>, vector<128x128xbf16>
    %cst = arith.constant dense<0.000000e+00> : vector<8x128xf32>
    %2 = tpu.matmul %0, %1, %cst {dimension_numbers = #tpu.dot_dimension_numbers<[1], [0], [0], [1], [0, 0, 1, 1], [], []>} : vector<8x128xbf16>, vector<128x128xbf16>, vector<8x128xf32> -> vector<8x128xf32>
    %c0_3 = arith.constant 0 : index
    %c0_4 = arith.constant 0 : index
    %3 = vector.load %arg3[%c0_3, %c0_4] : memref<1x128xf32, #tpu.memory_space<vmem>>, vector<1x128xf32>
    %4 = vector.broadcast %3 : vector<1x128xf32> to vector<8x128xf32>
    %5 = arith.addf %2, %4 : vector<8x128xf32>
    %cst_5 = arith.constant 0.000000e+00 : f32
    %6 = vector.broadcast %cst_5 : f32 to vector<8x128xf32>
    %7 = arith.cmpf ogt, %5, %6 : vector<8x128xf32>
    %cst_6 = arith.constant 2.000000e-01 : f32
    %8 = vector.broadcast %cst_6 : f32 to vector<8x128xf32>
    %9 = arith.mulf %8, %5 : vector<8x128xf32>
    %10 = arith.select %7, %5, %9 : vector<8x128xi1>, vector<8x128xf32>
    %11 = arith.truncf %10 : vector<8x128xf32> to vector<8x128xbf16>
    %c0_7 = arith.constant 0 : index
    %c0_8 = arith.constant 0 : index
    %12 = vector.load %arg4[%c0_7, %c0_8] : memref<128x128xbf16, #tpu.memory_space<vmem>>, vector<128x128xbf16>
    %cst_9 = arith.constant dense<0.000000e+00> : vector<8x128xf32>
    %13 = tpu.matmul %11, %12, %cst_9 {dimension_numbers = #tpu.dot_dimension_numbers<[1], [0], [0], [1], [0, 0, 1, 1], [], []>} : vector<8x128xbf16>, vector<128x128xbf16>, vector<8x128xf32> -> vector<8x128xf32>
    %c0_10 = arith.constant 0 : index
    %c0_11 = arith.constant 0 : index
    %14 = vector.load %arg5[%c0_10, %c0_11] : memref<1x128xf32, #tpu.memory_space<vmem>>, vector<1x128xf32>
    %15 = vector.broadcast %14 : vector<1x128xf32> to vector<8x128xf32>
    %16 = arith.addf %13, %15 : vector<8x128xf32>
    %cst_12 = arith.constant 0.000000e+00 : f32
    %17 = vector.broadcast %cst_12 : f32 to vector<8x128xf32>
    %18 = arith.cmpf ogt, %16, %17 : vector<8x128xf32>
    %cst_13 = arith.constant 2.000000e-01 : f32
    %19 = vector.broadcast %cst_13 : f32 to vector<8x128xf32>
    %20 = arith.mulf %19, %16 : vector<8x128xf32>
    %21 = arith.select %18, %16, %20 : vector<8x128xi1>, vector<8x128xf32>
    %22 = arith.truncf %21 : vector<8x128xf32> to vector<8x128xbf16>
    %c0_14 = arith.constant 0 : index
    %c0_15 = arith.constant 0 : index
    %23 = vector.load %arg6[%c0_14, %c0_15] : memref<128x128xbf16, #tpu.memory_space<vmem>>, vector<128x128xbf16>
    %cst_16 = arith.constant dense<0.000000e+00> : vector<8x128xf32>
    %24 = tpu.matmul %22, %23, %cst_16 {dimension_numbers = #tpu.dot_dimension_numbers<[1], [0], [0], [1], [0, 0, 1, 1], [], []>} : vector<8x128xbf16>, vector<128x128xbf16>, vector<8x128xf32> -> vector<8x128xf32>
    %c0_17 = arith.constant 0 : index
    %c0_18 = arith.constant 0 : index
    %25 = vector.load %arg7[%c0_17, %c0_18] : memref<1x128xf32, #tpu.memory_space<vmem>>, vector<1x128xf32>
    %26 = vector.broadcast %25 : vector<1x128xf32> to vector<8x128xf32>
    %27 = arith.addf %24, %26 : vector<8x128xf32>
    %cst_19 = arith.constant 0.000000e+00 : f32
    %28 = vector.broadcast %cst_19 : f32 to vector<8x128xf32>
    %29 = arith.subf %28, %27 : vector<8x128xf32>
    %30 = math.exp %29 : vector<8x128xf32>
    %cst_20 = arith.constant 1.000000e+00 : f32
    %31 = vector.broadcast %cst_20 : f32 to vector<8x128xf32>
    %32 = arith.addf %31, %30 : vector<8x128xf32>
    %cst_21 = arith.constant 1.000000e+00 : f32
    %33 = vector.broadcast %cst_21 : f32 to vector<8x128xf32>
    %34 = arith.divf %33, %32 : vector<8x128xf32>
    %c0_22 = arith.constant 0 : index
    %c0_23 = arith.constant 0 : index
    %35 = vector.load %arg8[%c0_22, %c0_23] : memref<8x128xf32, #tpu.memory_space<vmem>>, vector<8x128xf32>
    tpu.vector_store %arg8[%c0_22, %c0_23], %34 {strides = array<i32>} : memref<8x128xf32, #tpu.memory_space<vmem>>, vector<8x128xf32>,
    return
  }
  func.func @transform_0(%arg0: i32) -> (i32, i32) {
    %c0_i32 = arith.constant 0 : i32
    %c0_i32_0 = arith.constant 0 : i32
    return %arg0, %c0_i32 : i32, i32
  }
  func.func @transform_1(%arg0: i32) -> (i32, i32) {
    %c0_i32 = arith.constant 0 : i32
    %c0_i32_0 = arith.constant 0 : i32
    %c0_i32_1 = arith.constant 0 : i32
    return %c0_i32, %c0_i32_0 : i32, i32
  }
  func.func @transform_2(%arg0: i32) -> (i32, i32) {
    %c0_i32 = arith.constant 0 : i32
    %c0_i32_0 = arith.constant 0 : i32
    %c0_i32_1 = arith.constant 0 : i32
    return %c0_i32, %c0_i32_0 : i32, i32
  }
  func.func @transform_3(%arg0: i32) -> (i32, i32) {
    %c0_i32 = arith.constant 0 : i32
    %c0_i32_0 = arith.constant 0 : i32
    %c0_i32_1 = arith.constant 0 : i32
    return %c0_i32, %c0_i32_0 : i32, i32
  }
  func.func @transform_4(%arg0: i32) -> (i32, i32) {
    %c0_i32 = arith.constant 0 : i32
    %c0_i32_0 = arith.constant 0 : i32
    %c0_i32_1 = arith.constant 0 : i32
    return %c0_i32, %c0_i32_0 : i32, i32
  }
  func.func @transform_5(%arg0: i32) -> (i32, i32) {
    %c0_i32 = arith.constant 0 : i32
    %c0_i32_0 = arith.constant 0 : i32
    %c0_i32_1 = arith.constant 0 : i32
    return %c0_i32, %c0_i32_0 : i32, i32
  }
  func.func @transform_6(%arg0: i32) -> (i32, i32) {
    %c0_i32 = arith.constant 0 : i32
    %c0_i32_0 = arith.constant 0 : i32
    %c0_i32_1 = arith.constant 0 : i32
    return %c0_i32, %c0_i32_0 : i32, i32
  }
  func.func @transform_7(%arg0: i32) -> (i32, i32) {
    %c0_i32 = arith.constant 0 : i32
    %c0_i32_0 = arith.constant 0 : i32
    return %arg0, %c0_i32 : i32, i32
  }
}

</mosaic_0001>

<bundles_post_ra>
// kernel: discriminator_forward.1
= control target key start
LH: loop header
LB: loop body
LE: loop exit
PB: predicated region body
PF: predicated region fallthrough
CT: control target
= control target key end

     0   :  { %12 = vsyncpa [#allocation3], 0  ;;  %s786_s0 = inlined_call_operand.vmem [shape: bf16[8,128], index: 0, kind: input, shape index: {}]   ;;  %s787_s1 = inlined_call_operand.hbm [shape: bf16[128,128], index: 1, kind: input, shape index: {}]   ;;  %s788_s2 = inlined_call_operand.vmem [shape: f32[1,128], index: 2, kind: input, shape index: {}]   ;;  %s789_s3 = inlined_call_operand.hbm [shape: bf16[128,128], index: 3, kind: input, shape index: {}]   ;;  %s790_s4 = inlined_call_operand.vmem [shape: f32[1,128], index: 4, kind: input, shape index: {}]   ;;  %s791_s5 = inlined_call_operand.hbm [shape: bf16[128,128], index: 5, kind: input, shape index: {}]   ;;  %s792_s6 = inlined_call_operand.vmem [shape: f32[1,128], index: 6, kind: input, shape index: {}]   ;;  %s793_s7 = inlined_call_operand.vmem [shape: f32[8,128], index: 7, kind: output, shape index: {}]  }
   0x1   :  { %13 = vsyncpa [#allocation5], 0  ;;  %s642_s24 = smov [#allocation4]   ;;  %s643_s26 = smov [#allocation2]  }
   0x2   :  { %s35_s25 = sshll.u32 %s642_s24, 4  ;;  %s21_s27 = sshll.u32 %s643_s26, 4  ;;  %s36_s25 = int_to_ptr.vmem [resolvable:$true] %s35_s25  ;;  %s689_s27 = int_to_ptr.vmem [resolvable:$true] %s21_s27 }
   0x3   :  { %s572_s30 = scalar_lea.hbm %s789_s3, 1024 }
   0x4   :  { %p573_p0 = scmp.ne.s32.totalorder %s789_s3, %s572_s30  ;;  %p576_p1 = scmp.lt.u32.totalorder %s572_s30, %s789_s3 }
   0x6   :  { %p578_p2 = pnand %p576_p1, %p573_p0 }
   0x8   :  { %581 = shalt.err (!%p578_p2)
}
   0x9   :  { %s582_s12 = scalar_lea.vmem %s36_s25, 1024  ;;  %p587_p4 = scmp.lt.s32.totalorder %s36_s25, %s36_s25 }
   0xa   :  { %p583_p3 = scmp.ne.s32.totalorder %s36_s25, %s582_s12  ;;  %p588_p5 = scmp.lt.s32.totalorder %s582_s12, %s582_s12 }
   0xc   :  { %p589_p6 = por %p588_p5, %p587_p4 }
   0xe   :  { %p590_p7 = pnand %p589_p6, %p583_p3 }
  0x10   :  { %593 = shalt.err (!%p590_p7)
}
  0x11   :  { %s644_s13 = smov 64   ;;  %s645_s14 = smov 4  }
  0x12   :  { %41 = dma.hbm_to_vmem [thread:$0]  %s789_s3, 1024, %s36_s25, [#allocation5], %s644_s13, %s644_s13, %s645_s14  }
  0x13   :  { %s594_s19 = scalar_lea.hbm %s787_s1, 1024 }
  0x14   :  { %p595_p8 = scmp.ne.s32.totalorder %s787_s1, %s594_s19  ;;  %p598_p9 = scmp.lt.u32.totalorder %s594_s19, %s787_s1 }
  0x16   :  { %p600_p10 = pnand %p598_p9, %p595_p8 }
  0x18   :  { %603 = shalt.err (!%p600_p10)
}
  0x19   :  { %s604_s24 = scalar_lea.vmem %s689_s27, 1024  ;;  %p609_p12 = scmp.lt.s32.totalorder %s689_s27, %s689_s27 }
  0x1a   :  { %p605_p11 = scmp.ne.s32.totalorder %s689_s27, %s604_s24  ;;  %p610_p13 = scmp.lt.s32.totalorder %s604_s24, %s604_s24 }
  0x1c   :  { %p611_p0 = por %p610_p13, %p609_p12 }
  0x1e   :  { %p612_p1 = pnand %p611_p0, %p605_p11 }
  0x20   :  { %615 = shalt.err (!%p612_p1)
}
  0x21   :  { %27 = dma.hbm_to_vmem [thread:$0]  %s787_s1, 1024, %s689_s27, [#allocation3], %s644_s13, %s644_s13, %s645_s14  }
  0x22   :  { %s646_s26 = smov [#allocation6]   ;;  %s616_s8 = scalar_lea.hbm %s791_s5, 1024 }
  0x23   :  { %s49_s28 = sshll.u32 %s646_s26, 4  ;;  %p617_p2 = scmp.ne.s32.totalorder %s791_s5, %s616_s8  ;;  %s50_s28 = int_to_ptr.vmem [resolvable:$true] %s49_s28 }
  0x24   :  { %p620_p3 = scmp.lt.u32.totalorder %s616_s8, %s791_s5 }
  0x26   :  { %p622_p4 = pnand %p620_p3, %p617_p2 }
  0x28   :  { %625 = shalt.err (!%p622_p4)
}
  0x29   :  { %s626_s15 = scalar_lea.vmem %s50_s28, 1024  ;;  %p631_p6 = scmp.lt.s32.totalorder %s50_s28, %s50_s28 }
  0x2a   :  { %p627_p5 = scmp.ne.s32.totalorder %s50_s28, %s626_s15  ;;  %p632_p7 = scmp.lt.s32.totalorder %s626_s15, %s626_s15 }
  0x2c   :  { %p633_p8 = por %p632_p7, %p631_p6 }
  0x2e   :  { %p634_p9 = pnand %p633_p8, %p627_p5 }
  0x30   :  { %637 = shalt.err (!%p634_p9)
}
  0x31   :  { %55 = dma.hbm_to_vmem [thread:$0]  %s791_s5, 1024, %s50_s28, [#allocation5], %s644_s13, %s644_s13, %s645_s14  }
  0x32   :  { %638 = dma.done.wait [#allocation3], 1024  }
  0x33   :  { %639 = vsyncadd [#allocation3], 4294966272 }
  0x34   :  { %640 = dma.done.wait [#allocation5], 2048  }
  0x35   :  { %641 = vsyncadd [#allocation5], 4294965248  ;;  %v647_v0 = vmov 0.0   ;;  %vm648_vm0 = vmmov 0   ;;  %v544_v1 = vld [vmem:[#allocation2] sm:$0xff]   ;;  %v545_v2 = vld [vmem:[#allocation2 + $0x8] sm:$0xff]  }
  0x36   :  { %477 = vmatprep.subr.bf16.mxu0 %v647_v0  ;;  %493 = vmatprep.mubr.msk.bf16.mxu0 %vm648_vm0, %v647_v0  ;;  %v546_v3 = vld [vmem:[#allocation2 + $0x10] sm:$0xff]   ;;  %v552_v4 = vld [vmem:[#allocation4] sm:$0xff]   ;;  %v547_v5 = vld [vmem:[#allocation2 + $0x18] sm:$0xff]  }
  0x37   :  { %497 = vmatprep.subr.bf16.mxu1 %v647_v0  ;;  %513 = vmatprep.mubr.msk.bf16.mxu1 %vm648_vm0, %v647_v0  ;;  %v553_v6 = vld [vmem:[#allocation4 + $0x8] sm:$0xff]   ;;  %v548_v7 = vld [vmem:[#allocation2 + $0x20] sm:$0xff]   ;;  %v554_v8 = vld [vmem:[#allocation4 + $0x10] sm:$0xff]  }
  0x38   :  { %478 = vmatpush3.bf16.msra.mxu0 %v544_v1  ;;  %498 = vmatpush3.bf16.msra.mxu1 %v552_v4  ;;  %v549_v9 = vld [vmem:[#allocation2 + $0x28] sm:$0xff]   ;;  %v555_v10 = vld [vmem:[#allocation4 + $0x18] sm:$0xff]   ;;  %v550_v11 = vld [vmem:[#allocation2 + $0x30] sm:$0xff]  }
  0x39   :  { %479 = vmatprep.subr.bf16.mxu0 %v647_v0  ;;  %499 = vmatprep.subr.bf16.mxu1 %v647_v0  ;;  %v556_v12 = vld [vmem:[#allocation4 + $0x20] sm:$0xff]   ;;  %v551_v13 = vld [vmem:[#allocation2 + $0x38] sm:$0xff]   ;;  %v557_v14 = vld [vmem:[#allocation4 + $0x28] sm:$0xff]  }
  0x3a   :  { %v68_v15 = vld [vmem:[%s786_s0] sm:$0xf]  ;;  %v558_v16 = vld [vmem:[#allocation4 + $0x30] sm:$0xff]   ;;  %v559_v17 = vld [vmem:[#allocation4 + $0x38] sm:$0xff]  }
  0x3b   :  { %v560_v18 = vld [vmem:[#allocation6] sm:$0xff]   ;;  %v561_v19 = vld [vmem:[#allocation6 + $0x8] sm:$0xff]   ;;  %v562_v20 = vld [vmem:[#allocation6 + $0x10] sm:$0xff]  }
  0x3c   :  { %480 = vmatpush3.bf16.msra.mxu0 %v545_v2  ;;  %500 = vmatpush3.bf16.msra.mxu1 %v553_v6  ;;  %v563_v21 = vld [vmem:[#allocation6 + $0x18] sm:$0xff]   ;;  %v564_v22 = vld [vmem:[#allocation6 + $0x20] sm:$0xff]   ;;  %v565_v23 = vld [vmem:[#allocation6 + $0x28] sm:$0xff]  }
  0x3d   :  { %481 = vmatprep.subr.bf16.mxu0 %v647_v0  ;;  %501 = vmatprep.subr.bf16.mxu1 %v647_v0  ;;  %v423_v24 = vld [vmem:[%s788_s2] ss:$0 sm:$0xff]  ;;  %v566_v33 = vld [vmem:[#allocation6 + $0x30] sm:$0xff]   ;;  %v567_v34 = vld [vmem:[#allocation6 + $0x38] sm:$0xff]  }
  0x3e   :  { %v432_v35 = vld [vmem:[%s790_s4] ss:$0 sm:$0xff] }
  0x3f   :  { %v441_v44 = vld [vmem:[%s792_s6] ss:$0 sm:$0xff] }
  0x40   :  { %482 = vmatpush3.bf16.msra.mxu0 %v546_v3  ;;  %502 = vmatpush3.bf16.msra.mxu1 %v554_v8 }
  0x41   :  { %483 = vmatprep.subr.bf16.mxu0 %v647_v0  ;;  %503 = vmatprep.subr.bf16.mxu1 %v647_v0 }
  0x44   :  { %484 = vmatpush3.bf16.msra.mxu0 %v547_v5  ;;  %504 = vmatpush3.bf16.msra.mxu1 %v555_v10 }
  0x45   :  { %485 = vmatprep.subr.bf16.mxu0 %v647_v0  ;;  %505 = vmatprep.subr.bf16.mxu1 %v647_v0 }
  0x48   :  { %486 = vmatpush3.bf16.msra.mxu0 %v548_v7  ;;  %506 = vmatpush3.bf16.msra.mxu1 %v556_v12 }
  0x49   :  { %487 = vmatprep.subr.bf16.mxu0 %v647_v0  ;;  %507 = vmatprep.subr.bf16.mxu1 %v647_v0 }
  0x4c   :  { %488 = vmatpush3.bf16.msra.mxu0 %v549_v9  ;;  %508 = vmatpush3.bf16.msra.mxu1 %v557_v14 }
  0x4d   :  { %489 = vmatprep.subr.bf16.mxu0 %v647_v0  ;;  %509 = vmatprep.subr.bf16.mxu1 %v647_v0 }
  0x50   :  { %490 = vmatpush3.bf16.msra.mxu0 %v550_v11  ;;  %510 = vmatpush3.bf16.msra.mxu1 %v558_v16 }
  0x51   :  { %491 = vmatprep.subr.bf16.mxu0 %v647_v0  ;;  %511 = vmatprep.subr.bf16.mxu1 %v647_v0 }
  0x54   :  { %492 = vmatpush3.bf16.msra.mxu0 %v551_v13  ;;  %512 = vmatpush3.bf16.msra.mxu1 %v559_v17 }
  0x55   :  { %517 = vmatprep.subr.bf16.mxu0 %v647_v0 }
  0x57   :  { %494 = vmatmul.mubr.bf16.vlgmr.msra.gmra.mrb[0].mxu0 %v68_v15 }
  0x58   :  { %533 = vmatprep.mubr.msk.bf16.mxu0 %vm648_vm0, %v647_v0  ;;  %518 = vmatpush3.bf16.msra.mxu0 %v560_v18 }
  0x59   :  { %519 = vmatprep.subr.bf16.mxu0 %v647_v0 }
  0x5c   :  { %520 = vmatpush3.bf16.msra.mxu0 %v561_v19 }
  0x5d   :  { %521 = vmatprep.subr.bf16.mxu0 %v647_v0 }
  0x60   :  { %522 = vmatpush3.bf16.msra.mxu0 %v562_v20 }
  0x61   :  { %523 = vmatprep.subr.bf16.mxu0 %v647_v0 }
  0x64   :  { %524 = vmatpush3.bf16.msra.mxu0 %v563_v21 }
  0x65   :  { %525 = vmatprep.subr.bf16.mxu0 %v647_v0 }
  0x68   :  { %526 = vmatpush3.bf16.msra.mxu0 %v564_v22 }
  0x69   :  { %527 = vmatprep.subr.bf16.mxu0 %v647_v0 }
  0x6c   :  { %528 = vmatpush3.bf16.msra.mxu0 %v565_v23 }
  0x6d   :  { %529 = vmatprep.subr.bf16.mxu0 %v647_v0 }
  0x70   :  { %530 = vmatpush3.bf16.msra.mxu0 %v566_v33 }
  0x71   :  { %531 = vmatprep.subr.bf16.mxu0 %v647_v0 }
  0x74   :  { %532 = vmatpush3.bf16.msra.mxu0 %v567_v34 }
 0x12a   :  { %v174_v25 = vpop.f32.mrb[0].mxu0 }
 0x12b   :  { %v175_v26 = vadd.f32 %v423_v24, %v174_v25  ;;  %v495_v27 = vpop.f32.mrb[1].mxu0 }
 0x12c   :  { %v177_v28 = vpop.f32.mrb[2].mxu0 }
 0x12d   :  { %vm180_vm1 = vcmp.gt.f32.partialorder %v175_v26, 0.0  ;;  %v181_v29 = vmul.f32 0.2, %v175_v26  ;;  %v496_v30 = vpop.f32.mrb[3].mxu0 }
 0x12f   :  { %v182_v31 = vsel %vm180_vm1, %v175_v26, %v181_v29 }
 0x130   :  { %v183_v32 = vpack.c.bf16 %v182_v31, %v182_v31 }
 0x132   :  { %514 = vmatmul.mubr.bf16.vlgmr.msra.gmra.mrb[0].mxu1 %v183_v32 }
 0x205   :  { %v289_v36 = vpop.f32.mrb[0].mxu1 }
 0x206   :  { %v290_v37 = vadd.f32 %v432_v35, %v289_v36  ;;  %v515_v38 = vpop.f32.mrb[1].mxu1 }
 0x207   :  { %v292_v39 = vpop.f32.mrb[2].mxu1 }
 0x208   :  { %vm295_vm2 = vcmp.gt.f32.partialorder %v290_v37, 0.0  ;;  %v296_v40 = vmul.f32 0.2, %v290_v37  ;;  %v516_v41 = vpop.f32.mrb[3].mxu1 }
 0x20a   :  { %v297_v42 = vsel %vm295_vm2, %v290_v37, %v296_v40 }
 0x20b   :  { %v298_v43 = vpack.c.bf16 %v297_v42, %v297_v42 }
 0x20d   :  { %534 = vmatmul.mubr.bf16.vlgmr.msra.gmra.mrb[4].mxu0 %v298_v43 }
 0x2e0   :  { %v404_v45 = vpop.f32.mrb[4].mxu0 }
 0x2e1   :  { %v405_v46 = vadd.f32 %v441_v44, %v404_v45  ;;  %v535_v47 = vpop.f32.mrb[5].mxu0 }
 0x2e2   :  { %v407_v48 = vpop.f32.mrb[6].mxu0 }
 0x2e3   :  { %v410_v49 = vsub.f32 0.0, %v405_v46  ;;  %v536_v50 = vpop.f32.mrb[7].mxu0 }
 0x2e5   :  { %v411_v51 = vmul.f32 1.442695, %v410_v49 }
 0x2e7   :  { %568 = vpow2.f32 %v411_v51 }
 0x2f1   :  { %v569_v52 = vpop.eup %568 }
 0x2f2   :  { %v413_v53 = vadd.f32 1.0, %v569_v52 }
 0x2f4   :  { %570 = vrcp.f32 %v413_v53 }
 0x2fe   :  { %v571_v54 = vpop.eup %570 }
 0x2ff   :  { %416 = vst [vmem:[%s793_s7] sm:$0xff] %v571_v54 }
 0x300   :  { %421 = vsyncpa [#allocation3], 1 }
 0x301   :  { %422 = vsyncpa [#allocation5], 1 }

</bundles_post_ra>
